<compile_context>
chip_gen: v7x
topology: tpu7x:2x2x1
jax: 0.10.0
libtpu: 0.0.40
codegen_flags: <defaults>
</compile_context>

<pallas_src>
import jax
import jax.numpy as jnp
from jax.experimental import pallas as pl
from jax.experimental.pallas import tpu as pltpu


def nae_clx_kernel(x_ref,
                   w15_ref, b15_ref,   # fused encoder-l1 || varnet-l1   (D, 2H)
                   w23_ref, b23_ref,   # folded W2 @ W3                  (H, H)
                   w4_ref, b4_ref,     # decoder output layer            (H, D)
                   w6_ref,             # varnet head row vector          (1, H)
                   b6_ref,             # varnet head bias (SMEM scalar)  (1, 1)
                   e_ref):
    x = x_ref[...]                                     # (B, D) f32
    x_bf = x.astype(jnp.bfloat16)

    # ---- fused first layers of encoder and varnet: one MXU pass over x ----
    h15 = jnp.maximum(
        jnp.dot(x_bf, w15_ref[...], preferred_element_type=jnp.float32)
        + b15_ref[...], 0.0)                           # (B, 2H) f32
    H = w23_ref.shape[0]
    h_e = h15[:, :H]                                   # encoder hidden
    h_v = h15[:, H:]                                   # varnet hidden

    # ---- decoder hidden with W2 @ W3 folded (no activation between, z unused) ----
    h_d = jnp.maximum(
        jnp.dot(h_e.astype(jnp.bfloat16), w23_ref[...],
                preferred_element_type=jnp.float32) + b23_ref[...], 0.0)

    # ---- reconstruction ----
    recon = jnp.dot(h_d.astype(jnp.bfloat16), w4_ref[...],
                    preferred_element_type=jnp.float32) + b4_ref[...]   # (B, D)

    # ---- varnet head: N=1 output done as a lane (XLU) reduction, not MXU ----
    v = jnp.sum(h_v * w6_ref[...], axis=-1, keepdims=True) + b6_ref[0, 0]  # (B,1)

    # ---- energy (varparam=None branch): mse / exp(v) + v == mse*exp(-v) + v ----
    diff = recon - x
    mse = jnp.mean(diff * diff, axis=-1, keepdims=True)                    # (B,1)
    e_ref[...] = mse * jnp.exp(-v) + v


def _fuse_params(params):
    """Algebraic folds done outside the kernel (precompute once in practice)."""
    w15 = jnp.concatenate([params["w1"], params["w5"]], axis=1).astype(jnp.bfloat16)
    b15 = jnp.concatenate([params["b1"], params["b5"]], axis=1)            # f32 (1,2H)
    w23 = jnp.dot(params["w2"], params["w3"]).astype(jnp.bfloat16)          # (H, H)
    b23 = jnp.dot(params["b2"], params["w3"]) + params["b3"]                # f32 (1,H)
    return dict(w15=w15, b15=b15, w23=w23, b23=b23,
                w4=params["w4"].astype(jnp.bfloat16), b4=params["b4"],
                w6=params["w6"], b6=params["b6"])


@jax.jit
def nae_clx_forward(x_nchw, params):
    """x_nchw: (B, C, H, W) float32.  Returns E with shape (B,)."""
    B = x_nchw.shape[0]
    x_flat = x_nchw.reshape(B, -1).astype(jnp.float32)   # torch .view(len(x), -1)
    f = _fuse_params(params)

    vmem = pl.BlockSpec(memory_space=pltpu.MemorySpace.VMEM)
    smem = pl.BlockSpec(memory_space=pltpu.MemorySpace.SMEM)

    # NOTE: at B=2 one program is optimal.  If B grows, switch to a 1-D batch
    # grid: x/E tiled over batch, every weight with a constant index_map
    # (lambda i: (0, 0)) so it stays VMEM-resident, and
    # dimension_semantics=("parallel",) so v7x shards tiles over both TCs.
    e = pl.pallas_call(
        nae_clx_kernel,
        out_shape=jax.ShapeDtypeStruct((B, 1), jnp.float32),
        in_specs=[vmem,            # x
                  vmem, vmem,      # w15, b15
                  vmem, vmem,      # w23, b23
                  vmem, vmem,      # w4, b4
                  vmem,            # w6
                  smem],           # b6 scalar
        out_specs=vmem,
    )(x_flat, f["w15"], f["b15"], f["w23"], f["b23"],
      f["w4"], f["b4"], f["w6"], f["b6"])
    return e[:, 0]


def init_params(key, D, H, Z):
    """Deterministic synthetic parameters (no checkpoint loading)."""
    ks = jax.random.split(key, 7)
    s = lambda fan_in: 1.0 / jnp.sqrt(jnp.float32(fan_in))
    return {
        # encoder
        "w1": jax.random.normal(ks[0], (D, H), jnp.float32) * s(D),
        "b1": jnp.zeros((1, H), jnp.float32),
        "w2": jax.random.normal(ks[1], (H, Z), jnp.float32) * s(H),
        "b2": jnp.zeros((1, Z), jnp.float32),
        # decoder
        "w3": jax.random.normal(ks[2], (Z, H), jnp.float32) * s(Z),
        "b3": jnp.zeros((1, H), jnp.float32),
        "w4": jax.random.normal(ks[3], (H, D), jnp.float32) * s(H),
        "b4": jnp.zeros((1, D), jnp.float32),
        # varnet (final layer stored as a (1, H) row vector + scalar bias)
        "w5": jax.random.normal(ks[4], (D, H), jnp.float32) * s(D),
        "b5": jnp.zeros((1, H), jnp.float32),
        "w6": jax.random.normal(ks[5], (1, H), jnp.float32) * s(H),
        "b6": jnp.zeros((1, 1), jnp.float32),
    }


def nae_clx_reference_f32(x_nchw, params):
    """Faithful f32 reference of the PyTorch forward (unfused, divide form)."""
    B = x_nchw.shape[0]
    x = x_nchw.reshape(B, -1).astype(jnp.float32)
    h_e = jnp.maximum(x @ params["w1"] + params["b1"], 0.0)
    z = h_e @ params["w2"] + params["b2"]
    h_d = jnp.maximum(z @ params["w3"] + params["b3"], 0.0)
    recon = h_d @ params["w4"] + params["b4"]
    h_v = jnp.maximum(x @ params["w5"] + params["b5"], 0.0)
    v = jnp.sum(h_v * params["w6"], axis=-1) + params["b6"][0, 0]          # (B,)
    var = jnp.exp(v)
    mse = jnp.mean((recon - x) ** 2, axis=-1)
    return mse / var + v


def nae_clx_reference_matched(x_nchw, params):
    """Pure-JAX reference using exactly the kernel's folds + bf16 matmul inputs."""
    B = x_nchw.shape[0]
    x = x_nchw.reshape(B, -1).astype(jnp.float32)
    f = _fuse_params(params)
    x_bf = x.astype(jnp.bfloat16)
    h15 = jnp.maximum(
        jnp.dot(x_bf, f["w15"], preferred_element_type=jnp.float32) + f["b15"], 0.0)
    H = f["w23"].shape[0]
    h_e, h_v = h15[:, :H], h15[:, H:]
    h_d = jnp.maximum(
        jnp.dot(h_e.astype(jnp.bfloat16), f["w23"],
                preferred_element_type=jnp.float32) + f["b23"], 0.0)
    recon = jnp.dot(h_d.astype(jnp.bfloat16), f["w4"],
                    preferred_element_type=jnp.float32) + f["b4"]
    v = jnp.sum(h_v * f["w6"], axis=-1) + f["b6"][0, 0]
    mse = jnp.mean((recon - x) ** 2, axis=-1)
    return mse * jnp.exp(-v) + v


if __name__ == "__main__":
    # Small shapes consistent with the module: NCHW image input.
    B, C, Himg, Wimg = 2, 4, 16, 16
    D = C * Himg * Wimg          # 1024 flattened features
    Hhid, Z = 128, 32

    key = jax.random.PRNGKey(0)
    k_x, k_p = jax.random.split(key)
    x = jax.random.uniform(k_x, (B, C, Himg, Wimg), jnp.float32)
    params = init_params(k_p, D, Hhid, Z)

    E = nae_clx_forward(x, params)
    E = jax.block_until_ready(E)
    assert E.shape == (B,)

    # Exact-path check: same folds and bf16 matmul inputs as the kernel.
    E_matched = nae_clx_reference_matched(x, params)
    assert jnp.allclose(E, E_matched, rtol=2e-3, atol=2e-3), (E, E_matched)

    # Semantic check vs the faithful f32 PyTorch-equivalent forward; tolerance
    # is loose only because the kernel's matmul inputs are bf16.
    E_f32 = nae_clx_reference_f32(x, params)
    assert jnp.allclose(E, E_f32, rtol=1e-1, atol=1e-1), (E, E_f32)

    print("KERNEL_OK")
</pallas_src>

<mosaic_0001>
module attributes {stable_mosaic.version = 11 : i64} {
  func.func @nae_clx_kernel(%arg0: memref<2x1024xf32, #tpu.memory_space<vmem>>, %arg1: memref<1024x256xbf16, #tpu.memory_space<vmem>>, %arg2: memref<1x256xf32, #tpu.memory_space<vmem>>, %arg3: memref<128x128xbf16, #tpu.memory_space<vmem>>, %arg4: memref<1x128xf32, #tpu.memory_space<vmem>>, %arg5: memref<128x1024xbf16, #tpu.memory_space<vmem>>, %arg6: memref<1x1024xf32, #tpu.memory_space<vmem>>, %arg7: memref<1x128xf32, #tpu.memory_space<vmem>>, %arg8: memref<1x1xf32, #tpu.memory_space<smem>>, %arg9: memref<2x1xf32, #tpu.memory_space<vmem>>) attributes {dimension_semantics = [], scalar_prefetch = 0 : i64, scratch_operands = 0 : i64, tpu.core_type = #tpu.core_type<tc>} {
    %c0 = arith.constant 0 : index
    %c0_0 = arith.constant 0 : index
    %0 = vector.load %arg0[%c0, %c0_0] : memref<2x1024xf32, #tpu.memory_space<vmem>>, vector<2x1024xf32>
    %1 = arith.truncf %0 : vector<2x1024xf32> to vector<2x1024xbf16>
    %c0_1 = arith.constant 0 : index
    %c0_2 = arith.constant 0 : index
    %2 = vector.load %arg1[%c0_1, %c0_2] : memref<1024x256xbf16, #tpu.memory_space<vmem>>, vector<1024x256xbf16>
    %cst = arith.constant dense<0.000000e+00> : vector<2x256xf32>
    %3 = tpu.matmul %1, %2, %cst {dimension_numbers = #tpu.dot_dimension_numbers<[1], [0], [0], [1], [0, 0, 1, 1], [], []>} : vector<2x1024xbf16>, vector<1024x256xbf16>, vector<2x256xf32> -> vector<2x256xf32>
    %c0_3 = arith.constant 0 : index
    %c0_4 = arith.constant 0 : index
    %4 = vector.load %arg2[%c0_3, %c0_4] : memref<1x256xf32, #tpu.memory_space<vmem>>, vector<1x256xf32>
    %5 = vector.broadcast %4 : vector<1x256xf32> to vector<2x256xf32>
    %6 = arith.addf %3, %5 : vector<2x256xf32>
    %cst_5 = arith.constant 0.000000e+00 : f32
    %7 = vector.broadcast %cst_5 : f32 to vector<2x256xf32>
    %8 = arith.maximumf %6, %7 : vector<2x256xf32>
    %9 = vector.extract_strided_slice %8 {offsets = [0, 0], sizes = [2, 128], strides = [1, 1]} : vector<2x256xf32> to vector<2x128xf32>
    %10 = vector.extract_strided_slice %8 {offsets = [0, 128], sizes = [2, 128], strides = [1, 1]} : vector<2x256xf32> to vector<2x128xf32>
    %11 = arith.truncf %9 : vector<2x128xf32> to vector<2x128xbf16>
    %c0_6 = arith.constant 0 : index
    %c0_7 = arith.constant 0 : index
    %12 = vector.load %arg3[%c0_6, %c0_7] : memref<128x128xbf16, #tpu.memory_space<vmem>>, vector<128x128xbf16>
    %cst_8 = arith.constant dense<0.000000e+00> : vector<2x128xf32>
    %13 = tpu.matmul %11, %12, %cst_8 {dimension_numbers = #tpu.dot_dimension_numbers<[1], [0], [0], [1], [0, 0, 1, 1], [], []>} : vector<2x128xbf16>, vector<128x128xbf16>, vector<2x128xf32> -> vector<2x128xf32>
    %c0_9 = arith.constant 0 : index
    %c0_10 = arith.constant 0 : index
    %14 = vector.load %arg4[%c0_9, %c0_10] : memref<1x128xf32, #tpu.memory_space<vmem>>, vector<1x128xf32>
    %15 = vector.broadcast %14 : vector<1x128xf32> to vector<2x128xf32>
    %16 = arith.addf %13, %15 : vector<2x128xf32>
    %cst_11 = arith.constant 0.000000e+00 : f32
    %17 = vector.broadcast %cst_11 : f32 to vector<2x128xf32>
    %18 = arith.maximumf %16, %17 : vector<2x128xf32>
    %19 = arith.truncf %18 : vector<2x128xf32> to vector<2x128xbf16>
    %c0_12 = arith.constant 0 : index
    %c0_13 = arith.constant 0 : index
    %20 = vector.load %arg5[%c0_12, %c0_13] : memref<128x1024xbf16, #tpu.memory_space<vmem>>, vector<128x1024xbf16>
    %cst_14 = arith.constant dense<0.000000e+00> : vector<2x1024xf32>
    %21 = tpu.matmul %19, %20, %cst_14 {dimension_numbers = #tpu.dot_dimension_numbers<[1], [0], [0], [1], [0, 0, 1, 1], [], []>} : vector<2x128xbf16>, vector<128x1024xbf16>, vector<2x1024xf32> -> vector<2x1024xf32>
    %c0_15 = arith.constant 0 : index
    %c0_16 = arith.constant 0 : index
    %22 = vector.load %arg6[%c0_15, %c0_16] : memref<1x1024xf32, #tpu.memory_space<vmem>>, vector<1x1024xf32>
    %23 = vector.broadcast %22 : vector<1x1024xf32> to vector<2x1024xf32>
    %24 = arith.addf %21, %23 : vector<2x1024xf32>
    %c0_17 = arith.constant 0 : index
    %c0_18 = arith.constant 0 : index
    %25 = vector.load %arg7[%c0_17, %c0_18] : memref<1x128xf32, #tpu.memory_space<vmem>>, vector<1x128xf32>
    %26 = vector.broadcast %25 : vector<1x128xf32> to vector<2x128xf32>
    %27 = arith.mulf %10, %26 : vector<2x128xf32>
    %cst_19 = arith.constant dense<0.000000e+00> : vector<2xf32>
    %28 = vector.multi_reduction <add>, %27, %cst_19 [1] : vector<2x128xf32> to vector<2xf32>
    %29 = vector.shape_cast %28 : vector<2xf32> to vector<2x1xf32>
    %c0_20 = arith.constant 0 : index
    %c0_21 = arith.constant 0 : index
    %30 = memref.load %arg8[%c0_20, %c0_21] : memref<1x1xf32, #tpu.memory_space<smem>>
    %31 = vector.broadcast %30 : f32 to vector<2x1xf32>
    %32 = arith.addf %29, %31 : vector<2x1xf32>
    %33 = arith.subf %24, %0 : vector<2x1024xf32>
    %34 = arith.mulf %33, %33 : vector<2x1024xf32>
    %cst_22 = arith.constant dense<0.000000e+00> : vector<2xf32>
    %35 = vector.multi_reduction <add>, %34, %cst_22 [1] : vector<2x1024xf32> to vector<2xf32>
    %36 = vector.shape_cast %35 : vector<2xf32> to vector<2x1xf32>
    %cst_23 = arith.constant 1.024000e+03 : f32
    %37 = vector.broadcast %cst_23 : f32 to vector<2x1xf32>
    %38 = arith.divf %36, %37 : vector<2x1xf32>
    %cst_24 = arith.constant 0.000000e+00 : f32
    %39 = vector.broadcast %cst_24 : f32 to vector<2x1xf32>
    %40 = arith.subf %39, %32 : vector<2x1xf32>
    %41 = math.exp %40 : vector<2x1xf32>
    %42 = arith.mulf %38, %41 : vector<2x1xf32>
    %43 = arith.addf %42, %32 : vector<2x1xf32>
    %c0_25 = arith.constant 0 : index
    %c0_26 = arith.constant 0 : index
    %44 = vector.load %arg9[%c0_25, %c0_26] : memref<2x1xf32, #tpu.memory_space<vmem>>, vector<2x1xf32>
    tpu.vector_store %arg9[%c0_25, %c0_26], %43 {strides = array<i32>} : memref<2x1xf32, #tpu.memory_space<vmem>>, vector<2x1xf32>,
    return
  }
}

</mosaic_0001>

<bundles_post_ra>
// kernel: nae_clx_forward.1
= control target key start
LH: loop header
LB: loop body
LE: loop exit
PB: predicated region body
PF: predicated region fallthrough
CT: control target
= control target key end

     0   :  { %v2250_v9 = vmov 1983009808   ;;  %v42_v11 = vlaneseq  ;;  %vm2252_vm0 = vmmov 0   ;;  %vm1746_vm1 = vcmask 1041408   ;;  %s3034_s1 = inlined_call_operand.vmem [shape: bf16[1024,256], index: 1, kind: input, shape index: {}]   ;;  %s3035_s0 = inlined_call_operand.vmem [shape: f32[2,1024], index: 0, kind: input, shape index: {}]   ;;  %s3036_s3 = inlined_call_operand.vmem [shape: bf16[128,128], index: 3, kind: input, shape index: {}]   ;;  %s3037_s2 = inlined_call_operand.vmem [shape: f32[1,256], index: 2, kind: input, shape index: {}]   ;;  %s3038_s7 = inlined_call_operand.vmem [shape: f32[1,128], index: 7, kind: input, shape index: {}]   ;;  %s3039_s5 = inlined_call_operand.vmem [shape: bf16[128,1024], index: 5, kind: input, shape index: {}]   ;;  %s3040_s4 = inlined_call_operand.vmem [shape: f32[1,128], index: 4, kind: input, shape index: {}]   ;;  %s3041_s6 = inlined_call_operand.vmem [shape: f32[1,1024], index: 6, kind: input, shape index: {}]   ;;  %s3042_s8 = inlined_call_operand.<no memory space> [shape: f32[1,1], index: 8, kind: input, shape index: {}]   ;;  %s3043_s9 = inlined_call_operand.vmem [shape: f32[2,1], index: 9, kind: output, shape index: {}]  }
   0x1   :  { %v2046_v0 = vld [vmem:[%s3034_s1 + $0x104] ss:$8 sps:$4 sm:$0xff]   ;;  %v2048_v1 = vld [vmem:[%s3034_s1 + $0x100] ss:$8 sps:$4 sm:$0xff]   ;;  %v2049_v2 = vld [vmem:[%s3034_s1 + $0x114] ss:$8 sps:$4 sm:$0xff]   ;;  %v40_v10 = vunpack.c.l.s4 %v2250_v9 }
   0x2   :  { %909 = vmatprep.subr.bf16.mxu0 %v2046_v0  ;;  %v2051_v3 = vld [vmem:[%s3034_s1 + $0x110] ss:$8 sps:$4 sm:$0xff]   ;;  %v2052_v4 = vld [vmem:[%s3034_s1 + $0x124] ss:$8 sps:$4 sm:$0xff]   ;;  %v2054_v5 = vld [vmem:[%s3034_s1 + $0x120] ss:$8 sps:$4 sm:$0xff]  }
   0x3   :  { %910 = vmatpush1.bf16.msra.mxu0 %v2048_v1  ;;  %v2055_v6 = vld [vmem:[%s3034_s1 + $0x134] ss:$8 sps:$4 sm:$0xff]   ;;  %v2057_v7 = vld [vmem:[%s3034_s1 + $0x130] ss:$8 sps:$4 sm:$0xff]   ;;  %v2058_v8 = vld [vmem:[%s3034_s1 + $0x144] ss:$8 sps:$4 sm:$0xff]   ;;  %v41_v14 = vunpack.c.0.s8 %v40_v10 }
   0x4   :  { %911 = vmatprep.subr.bf16.mxu0 %v2049_v2  ;;  %v2060_v12 = vld [vmem:[%s3034_s1 + $0x140] ss:$8 sps:$4 sm:$0xff]   ;;  %v2061_v13 = vld [vmem:[%s3034_s1 + $0x154] ss:$8 sps:$4 sm:$0xff]   ;;  %v2337_v15 = vshrl.u32 %v42_v11, 7  ;;  %vm1793_vm2 = vcmask 1024  }
   0x5   :  { %v2063_v16 = vld [vmem:[%s3034_s1 + $0x150] ss:$8 sps:$4 sm:$0xff]   ;;  %v2064_v17 = vld [vmem:[%s3034_s1 + $0x164] ss:$8 sps:$4 sm:$0xff]   ;;  %v2066_v21 = vld [vmem:[%s3034_s1 + $0x160] ss:$8 sps:$4 sm:$0xff]  }
   0x6   :  { %v2346_v18 = vsub.s32 %v41_v14, %v2337_v15  ;;  %v34_v19 = vld [vmem:[%s3035_s0] sm:$0xff]  ;;  %v2067_v22 = vld [vmem:[%s3034_s1 + $0x174] ss:$8 sps:$4 sm:$0xff]   ;;  %v2069_v25 = vld [vmem:[%s3034_s1 + $0x170] ss:$8 sps:$4 sm:$0xff]  }
   0x7   :  { %912 = vmatpush1.bf16.msra.mxu0 %v2051_v3  ;;  %v38_v20 = vcombine.high %v34_v19, %v34_v19  ;;  %v2070_v26 = vld [vmem:[%s3034_s1 + $0x184] ss:$8 sps:$4 sm:$0xff]   ;;  %v2072_v28 = vld [vmem:[%s3034_s1 + $0x180] ss:$8 sps:$4 sm:$0xff]   ;;  %v2073_v29 = vld [vmem:[%s3034_s1 + $0x194] ss:$8 sps:$4 sm:$0xff]  }
   0x8   :  { %913 = vmatprep.subr.bf16.mxu0 %v2052_v4  ;;  %v2075_v30 = vld [vmem:[%s3034_s1 + $0x190] ss:$8 sps:$4 sm:$0xff]   ;;  %v2076_v31 = vld [vmem:[%s3034_s1 + $0x1a4] ss:$8 sps:$4 sm:$0xff]   ;;  %v2078_v32 = vld [vmem:[%s3034_s1 + $0x1a0] ss:$8 sps:$4 sm:$0xff]   ;;  %v2441_v50 = vrot.slane %v34_v19, %v2346_v18 }
   0x9   :  { %v2358_v23 = vrot.slane %v38_v20, %v2346_v18  ;;  %v2079_v33 = vld [vmem:[%s3034_s1 + $0x1b4] ss:$8 sps:$4 sm:$0xff]   ;;  %v2140_v34 = vld [vmem:[%s3034_s1 + $0x4] ss:$8 sps:$4 sm:$0xff]   ;;  %v2142_v35 = vld [vmem:[%s3034_s1] ss:$8 sps:$4 sm:$0xff]  }
   0xa   :  { %v2081_v36 = vld [vmem:[%s3034_s1 + $0x1b0] ss:$8 sps:$4 sm:$0xff]   ;;  %v2082_v37 = vld [vmem:[%s3034_s1 + $0x1c4] ss:$8 sps:$4 sm:$0xff]   ;;  %868 = vmatprep.subr.bf16.mxu1 %v2140_v34  ;;  %v2146_v38 = vld [vmem:[%s3034_s1 + $0x14] ss:$8 sps:$4 sm:$0xff]   ;;  %v2455_v54 = vcombine.high %v2441_v50, %v2441_v50 }
   0xb   :  { %914 = vmatpush1.bf16.msra.mxu0 %v2054_v5  ;;  %v2362_v24 = vcombine.high %v2358_v23, %v2358_v23  ;;  %869 = vmatpush1.bf16.msra.mxu1 %v2142_v35  ;;  %v2148_v39 = vld [vmem:[%s3034_s1 + $0x10] ss:$8 sps:$4 sm:$0xff]   ;;  %v2084_v40 = vld [vmem:[%s3034_s1 + $0x1c0] ss:$8 sps:$4 sm:$0xff]   ;;  %v2085_v41 = vld [vmem:[%s3034_s1 + $0x1d4] ss:$8 sps:$4 sm:$0xff]   ;;  %v82_v62 = vpack.c.bf16 %v2358_v23, %v2358_v23 }
   0xc   :  { %915 = vmatprep.subr.bf16.mxu0 %v2055_v6  ;;  %870 = vmatprep.subr.bf16.mxu1 %v2146_v38  ;;  %v2152_v42 = vld [vmem:[%s3034_s1 + $0x24] ss:$8 sps:$4 sm:$0xff]   ;;  %v2154_v43 = vld [vmem:[%s3034_s1 + $0x20] ss:$8 sps:$4 sm:$0xff]   ;;  %v2158_v44 = vld [vmem:[%s3034_s1 + $0x34] ss:$8 sps:$4 sm:$0xff]   ;;  %v81_v57 = vpack.c.bf16 %v2455_v54, %v2455_v54 }
   0xd   :  { %v83_v27 = vpack.c.bf16 %v2362_v24, %v2362_v24  ;;  %v2087_v45 = vld [vmem:[%s3034_s1 + $0x1d0] ss:$8 sps:$4 sm:$0xff]   ;;  %v2088_v46 = vld [vmem:[%s3034_s1 + $0x1e4] ss:$8 sps:$4 sm:$0xff]   ;;  %v2090_v51 = vld [vmem:[%s3034_s1 + $0x1e0] ss:$8 sps:$4 sm:$0xff]  }
   0xe   :  { %v2432_v47 = vld [vmem:[%s3035_s0 + $0x8] sm:$0xff]  ;;  %v2160_v48 = vld [vmem:[%s3034_s1 + $0x30] ss:$8 sps:$4 sm:$0xff]   ;;  %v2091_v53 = vld [vmem:[%s3034_s1 + $0x1f4] ss:$8 sps:$4 sm:$0xff]   ;;  %900 = vmatprep.mubr.bf16.mxu1 %v81_v57 }
   0xf   :  { %916 = vmatpush1.bf16.msra.mxu0 %v2057_v7  ;;  %941 = vmatprep.mubr.bf16.mxu0 %v83_v27  ;;  %v2164_v49 = vld [vmem:[%s3034_s1 + $0x44] ss:$8 sps:$4 sm:$0xff]   ;;  %v2448_v52 = vrot.slane %v2432_v47, %v2346_v18  ;;  %v2166_v55 = vld [vmem:[%s3034_s1 + $0x40] ss:$8 sps:$4 sm:$0xff]   ;;  %v2170_v56 = vld [vmem:[%s3034_s1 + $0x54] ss:$8 sps:$4 sm:$0xff]  }
  0x10   :  { %917 = vmatprep.subr.bf16.mxu0 %v2058_v8  ;;  %871 = vmatpush1.bf16.msra.mxu1 %v2148_v39  ;;  %v2093_v58 = vld [vmem:[%s3034_s1 + $0x1f0] ss:$8 sps:$4 sm:$0xff]   ;;  %v2097_v60 = vld [vmem:[%s3034_s1 + $0x204] ss:$8 sps:$4 sm:$0xff]   ;;  %v2095_v0 = vld [vmem:[%s3034_s1 + $0x200] ss:$8 sps:$4 sm:$0xff]  }
  0x11   :  { %872 = vmatprep.subr.bf16.mxu1 %v2152_v42  ;;  %v2470_v59 = vcombine.high %v2448_v52, %v2448_v52  ;;  %v2172_v61 = vld [vmem:[%s3034_s1 + $0x50] ss:$8 sps:$4 sm:$0xff]   ;;  %v2176_v63 = vld [vmem:[%s3034_s1 + $0x64] ss:$8 sps:$4 sm:$0xff]   ;;  %v2100_v2 = vld [vmem:[%s3034_s1 + $0x214] ss:$8 sps:$4 sm:$0xff]  }
  0x12   :  { %v2178_v3 = vld [vmem:[%s3034_s1 + $0x60] ss:$8 sps:$4 sm:$0xff]   ;;  %v2182_v4 = vld [vmem:[%s3034_s1 + $0x74] ss:$8 sps:$4 sm:$0xff]   ;;  %v2098_v5 = vld [vmem:[%s3034_s1 + $0x210] ss:$8 sps:$4 sm:$0xff]  }
  0x13   :  { %918 = vmatpush1.bf16.msra.mxu0 %v2060_v12  ;;  %v85_v1 = vpack.c.bf16 %v2470_v59, %v2470_v59  ;;  %v2103_v6 = vld [vmem:[%s3034_s1 + $0x224] ss:$8 sps:$4 sm:$0xff]   ;;  %v2184_v7 = vld [vmem:[%s3034_s1 + $0x70] ss:$8 sps:$4 sm:$0xff]   ;;  %v2101_v9 = vld [vmem:[%s3034_s1 + $0x220] ss:$8 sps:$4 sm:$0xff]  }
  0x14   :  { %919 = vmatprep.subr.bf16.mxu0 %v2061_v13  ;;  %873 = vmatpush1.bf16.msra.mxu1 %v2154_v43  ;;  %v2188_v8 = vld [vmem:[%s3034_s1 + $0x84] ss:$8 sps:$4 sm:$0xff]   ;;  %v2106_v10 = vld [vmem:[%s3034_s1 + $0x234] ss:$8 sps:$4 sm:$0xff]   ;;  %v2190_v11 = vld [vmem:[%s3034_s1 + $0x80] ss:$8 sps:$4 sm:$0xff]  }
  0x15   :  { %874 = vmatprep.subr.bf16.mxu1 %v2158_v44  ;;  %v2194_v12 = vld [vmem:[%s3034_s1 + $0x94] ss:$8 sps:$4 sm:$0xff]   ;;  %v2104_v13 = vld [vmem:[%s3034_s1 + $0x230] ss:$8 sps:$4 sm:$0xff]   ;;  %v2109_v14 = vld [vmem:[%s3034_s1 + $0x244] ss:$8 sps:$4 sm:$0xff]  }
  0x16   :  { %v2107_v19 = vld [vmem:[%s3034_s1 + $0x240] ss:$8 sps:$4 sm:$0xff]   ;;  %v2112_v20 = vld [vmem:[%s3034_s1 + $0x254] ss:$8 sps:$4 sm:$0xff]   ;;  %v2208_v27 = vld [vmem:[%s3034_s1 + $0xb0] ss:$8 sps:$4 sm:$0xff]  }
  0x17   :  { %920 = vmatpush1.bf16.msra.mxu0 %v2063_v16  ;;  %v2196_v16 = vld [vmem:[%s3034_s1 + $0x90] ss:$8 sps:$4 sm:$0xff]   ;;  %v2121_v34 = vld [vmem:[%s3034_s1 + $0x284] ss:$8 sps:$4 sm:$0xff]   ;;  %v2124_v38 = vld [vmem:[%s3034_s1 + $0x294] ss:$8 sps:$4 sm:$0xff]  }
  0x18   :  { %921 = vmatprep.subr.bf16.mxu0 %v2064_v17  ;;  %875 = vmatpush1.bf16.msra.mxu1 %v2160_v48  ;;  %v2200_v17 = vld [vmem:[%s3034_s1 + $0xa4] ss:$8 sps:$4 sm:$0xff]   ;;  %v2220_v35 = vld [vmem:[%s3034_s1 + $0xd0] ss:$8 sps:$4 sm:$0xff]   ;;  %v2226_v39 = vld [vmem:[%s3034_s1 + $0xe0] ss:$8 sps:$4 sm:$0xff]  }
  0x19   :  { %876 = vmatprep.subr.bf16.mxu1 %v2164_v49  ;;  %v2127_v42 = vld [vmem:[%s3034_s1 + $0x2a4] ss:$8 sps:$4 sm:$0xff]   ;;  %v2232_v43 = vld [vmem:[%s3034_s1 + $0xf0] ss:$8 sps:$4 sm:$0xff]   ;;  %v2125_v44 = vld [vmem:[%s3034_s1 + $0x2a0] ss:$8 sps:$4 sm:$0xff]  }
  0x1a   :  { %v2240_v48 = vld [vmem:[%s3036_s3] sm:$0xff]   ;;  %v2251_v49 = vmov 0.0   ;;  %v2136_v57 = vld [vmem:[%s3034_s1 + $0x2d4] ss:$8 sps:$4 sm:$0xff]  }
  0x1b   :  { %922 = vmatpush1.bf16.msra.mxu0 %v2066_v21  ;;  %v2202_v21 = vld [vmem:[%s3034_s1 + $0xa0] ss:$8 sps:$4 sm:$0xff]  }
  0x1c   :  { %923 = vmatprep.subr.bf16.mxu0 %v2067_v22  ;;  %877 = vmatpush1.bf16.msra.mxu1 %v2166_v55  ;;  %v2206_v22 = vld [vmem:[%s3034_s1 + $0xb4] ss:$8 sps:$4 sm:$0xff]   ;;  %v2241_v55 = vld [vmem:[%s3036_s3 + $0x8] sm:$0xff]  }
  0x1d   :  { %878 = vmatprep.subr.bf16.mxu1 %v2170_v56  ;;  %v2131_v56 = vld [vmem:[%s3034_s1 + $0x2c0] ss:$8 sps:$4 sm:$0xff]  }
  0x1f   :  { %924 = vmatpush1.bf16.msra.mxu0 %v2069_v25  ;;  %v2110_v25 = vld [vmem:[%s3034_s1 + $0x250] ss:$8 sps:$4 sm:$0xff]  }
  0x20   :  { %925 = vmatprep.subr.bf16.mxu0 %v2070_v26  ;;  %879 = vmatpush1.bf16.msra.mxu1 %v2172_v61  ;;  %v2115_v26 = vld [vmem:[%s3034_s1 + $0x264] ss:$8 sps:$4 sm:$0xff]   ;;  %v55_v61 = vcombine.high %v2432_v47, %v2432_v47  ;;  %v2145_v47 = vld [vmem:[%s3034_s1 + $0x2f4] ss:$8 sps:$4 sm:$0xff]  }
  0x21   :  { %880 = vmatprep.subr.bf16.mxu1 %v2176_v63  ;;  %v2243_v63 = vld [vmem:[%s3036_s3 + $0x18] sm:$0xff]  }
  0x23   :  { %926 = vmatpush1.bf16.msra.mxu0 %v2072_v28  ;;  %v2212_v28 = vld [vmem:[%s3034_s1 + $0xc4] ss:$8 sps:$4 sm:$0xff]  }
  0x24   :  { %927 = vmatprep.subr.bf16.mxu0 %v2073_v29  ;;  %881 = vmatpush1.bf16.msra.mxu1 %v2178_v3  ;;  %v2113_v29 = vld [vmem:[%s3034_s1 + $0x260] ss:$8 sps:$4 sm:$0xff]   ;;  %v2143_v3 = vld [vmem:[%s3034_s1 + $0x2f0] ss:$8 sps:$4 sm:$0xff]  }
  0x25   :  { %882 = vmatprep.subr.bf16.mxu1 %v2182_v4  ;;  %v2151_v4 = vld [vmem:[%s3034_s1 + $0x304] ss:$8 sps:$4 sm:$0xff]  }
  0x27   :  { %928 = vmatpush1.bf16.msra.mxu0 %v2075_v30  ;;  %v2118_v30 = vld [vmem:[%s3034_s1 + $0x274] ss:$8 sps:$4 sm:$0xff]  }
  0x28   :  { %929 = vmatprep.subr.bf16.mxu0 %v2076_v31  ;;  %883 = vmatpush1.bf16.msra.mxu1 %v2184_v7  ;;  %v2116_v31 = vld [vmem:[%s3034_s1 + $0x270] ss:$8 sps:$4 sm:$0xff]  }
  0x29   :  { %884 = vmatprep.subr.bf16.mxu1 %v2188_v8  ;;  %v2157_v8 = vld [vmem:[%s3034_s1 + $0x314] ss:$8 sps:$4 sm:$0xff]  }
  0x2b   :  { %930 = vmatpush1.bf16.msra.mxu0 %v2078_v32  ;;  %v2214_v32 = vld [vmem:[%s3034_s1 + $0xc0] ss:$8 sps:$4 sm:$0xff]  }
  0x2c   :  { %931 = vmatprep.subr.bf16.mxu0 %v2079_v33  ;;  %885 = vmatpush1.bf16.msra.mxu1 %v2190_v11  ;;  %v2218_v33 = vld [vmem:[%s3034_s1 + $0xd4] ss:$8 sps:$4 sm:$0xff]   ;;  %v2161_v11 = vld [vmem:[%s3034_s1 + $0x320] ss:$8 sps:$4 sm:$0xff]  }
  0x2d   :  { %886 = vmatprep.subr.bf16.mxu1 %v2194_v12  ;;  %v2169_v12 = vld [vmem:[%s3034_s1 + $0x334] ss:$8 sps:$4 sm:$0xff]  }
  0x2f   :  { %932 = vmatpush1.bf16.msra.mxu0 %v2081_v36  ;;  %v2224_v36 = vld [vmem:[%s3034_s1 + $0xe4] ss:$8 sps:$4 sm:$0xff]  }
  0x30   :  { %933 = vmatprep.subr.bf16.mxu0 %v2082_v37  ;;  %887 = vmatpush1.bf16.msra.mxu1 %v2196_v16  ;;  %v2119_v37 = vld [vmem:[%s3034_s1 + $0x280] ss:$8 sps:$4 sm:$0xff]  }
  0x31   :  { %888 = vmatprep.subr.bf16.mxu1 %v2200_v17  ;;  %v2173_v16 = vld [vmem:[%s3034_s1 + $0x340] ss:$8 sps:$4 sm:$0xff]   ;;  %v2181_v17 = vld [vmem:[%s3034_s1 + $0x354] ss:$8 sps:$4 sm:$0xff]  }
  0x33   :  { %934 = vmatpush1.bf16.msra.mxu0 %v2084_v40  ;;  %v2230_v40 = vld [vmem:[%s3034_s1 + $0xf4] ss:$8 sps:$4 sm:$0xff]  }
  0x34   :  { %935 = vmatprep.subr.bf16.mxu0 %v2085_v41  ;;  %889 = vmatpush1.bf16.msra.mxu1 %v2202_v21  ;;  %v2122_v41 = vld [vmem:[%s3034_s1 + $0x290] ss:$8 sps:$4 sm:$0xff]   ;;  %v2185_v21 = vld [vmem:[%s3034_s1 + $0x360] ss:$8 sps:$4 sm:$0xff]  }
  0x35   :  { %890 = vmatprep.subr.bf16.mxu1 %v2206_v22  ;;  %v2193_v22 = vld [vmem:[%s3034_s1 + $0x374] ss:$8 sps:$4 sm:$0xff]  }
  0x37   :  { %936 = vmatpush1.bf16.msra.mxu0 %v2087_v45  ;;  %v2130_v45 = vld [vmem:[%s3034_s1 + $0x2b4] ss:$8 sps:$4 sm:$0xff]  }
  0x38   :  { %937 = vmatprep.subr.bf16.mxu0 %v2088_v46  ;;  %891 = vmatpush1.bf16.msra.mxu1 %v2208_v27  ;;  %v80_v46 = vpack.c.bf16 %v2441_v50, %v2441_v50  ;;  %v2197_v27 = vld [vmem:[%s3034_s1 + $0x380] ss:$8 sps:$4 sm:$0xff]  }
  0x39   :  { %892 = vmatprep.subr.bf16.mxu1 %v2212_v28  ;;  %v2205_v28 = vld [vmem:[%s3034_s1 + $0x394] ss:$8 sps:$4 sm:$0xff]  }
  0x3b   :  { %938 = vmatpush1.bf16.msra.mxu0 %v2090_v51  ;;  %v2128_v51 = vld [vmem:[%s3034_s1 + $0x2b0] ss:$8 sps:$4 sm:$0xff]  }
  0x3c   :  { %939 = vmatprep.subr.bf16.mxu0 %v2091_v53  ;;  %893 = vmatpush1.bf16.msra.mxu1 %v2214_v32  ;;  %v2133_v53 = vld [vmem:[%s3034_s1 + $0x2c4] ss:$8 sps:$4 sm:$0xff]   ;;  %v2217_v32 = vld [vmem:[%s3034_s1 + $0x3b4] ss:$8 sps:$4 sm:$0xff]  }
  0x3d   :  { %894 = vmatprep.subr.bf16.mxu1 %v2218_v33  ;;  %v2215_v33 = vld [vmem:[%s3034_s1 + $0x3b0] ss:$8 sps:$4 sm:$0xff]  }
  0x3f   :  { %940 = vmatpush1.bf16.msra.mxu0 %v2093_v58  ;;  %v2242_v58 = vld [vmem:[%s3036_s3 + $0x10] sm:$0xff]  }
  0x40   :  { %950 = vmatprep.subr.bf16.mxu0 %v2097_v60  ;;  %895 = vmatpush1.bf16.msra.mxu1 %v2220_v35  ;;  %v2134_v60 = vld [vmem:[%s3034_s1 + $0x2d0] ss:$8 sps:$4 sm:$0xff]   ;;  %v2221_v35 = vld [vmem:[%s3034_s1 + $0x3c0] ss:$8 sps:$4 sm:$0xff]  }
  0x41   :  { %896 = vmatprep.subr.bf16.mxu1 %v2224_v36  ;;  %v2229_v36 = vld [vmem:[%s3034_s1 + $0x3d4] ss:$8 sps:$4 sm:$0xff]  }
  0x42   :  { %942 = vmatmul.mubr.bf16.vlgmr.msra.gmra.mrb[0].mxu0 %v82_v62  ;;  %v2139_v62 = vld [vmem:[%s3034_s1 + $0x2e4] ss:$8 sps:$4 sm:$0xff]  }
  0x43   :  { %951 = vmatpush1.bf16.msra.mxu0 %v2095_v0  ;;  %982 = vmatprep.mubr.bf16.mxu0 %v85_v1  ;;  %v2137_v0 = vld [vmem:[%s3034_s1 + $0x2e0] ss:$8 sps:$4 sm:$0xff]   ;;  %v2650_v1 = vrot.slane %v55_v61, %v2346_v18 }
  0x44   :  { %952 = vmatprep.subr.bf16.mxu0 %v2100_v2  ;;  %897 = vmatpush1.bf16.msra.mxu1 %v2226_v39  ;;  %v2244_v2 = vld [vmem:[%s3036_s3 + $0x20] sm:$0xff]  }
  0x45   :  { %898 = vmatprep.subr.bf16.mxu1 %v2230_v40  ;;  %v2664_v18 = vcombine.high %v2650_v1, %v2650_v1  ;;  %v2233_v39 = vld [vmem:[%s3034_s1 + $0x3e0] ss:$8 sps:$4 sm:$0xff]   ;;  %v2238_v40 = vld [vmem:[%s3034_s1 + $0x3f4] ss:$8 sps:$4 sm:$0xff]  }
  0x47   :  { %953 = vmatpush1.bf16.msra.mxu0 %v2098_v5  ;;  %v84_v5 = vpack.c.bf16 %v2448_v52, %v2448_v52  ;;  %v87_v7 = vpack.c.bf16 %v2664_v18, %v2664_v18 }
  0x48   :  { %954 = vmatprep.subr.bf16.mxu0 %v2103_v6  ;;  %899 = vmatpush1.bf16.msra.mxu1 %v2232_v43  ;;  %v2149_v6 = vld [vmem:[%s3034_s1 + $0x300] ss:$8 sps:$4 sm:$0xff]  }
  0x49   :  { %2010 = vmatprep.subr.bf16.mxu1 %v2251_v49  ;;  %v2245_v43 = vld [vmem:[%s3036_s3 + $0x28] sm:$0xff]  }
  0x4b   :  { %955 = vmatpush1.bf16.msra.mxu0 %v2101_v9  ;;  %901 = vmatmul.mubr.bf16.vlgmr.msra.gmra.mrb[0].mxu1 %v80_v46  ;;  %v2155_v9 = vld [vmem:[%s3034_s1 + $0x310] ss:$8 sps:$4 sm:$0xff]  }
  0x4c   :  { %956 = vmatprep.subr.bf16.mxu0 %v2106_v10  ;;  %2011 = vmatpush3.bf16.msra.mxu1 %v2240_v48  ;;  %v2163_v10 = vld [vmem:[%s3034_s1 + $0x324] ss:$8 sps:$4 sm:$0xff]  }
  0x4d   :  { %2012 = vmatprep.subr.bf16.mxu1 %v2251_v49  ;;  %2026 = vmatprep.mubr.msk.bf16.mxu1 %vm2252_vm0, %v2251_v49 }
  0x4f   :  { %957 = vmatpush1.bf16.msra.mxu0 %v2104_v13  ;;  %v2167_v13 = vld [vmem:[%s3034_s1 + $0x330] ss:$8 sps:$4 sm:$0xff]  }
  0x50   :  { %958 = vmatprep.subr.bf16.mxu0 %v2109_v14  ;;  %2013 = vmatpush3.bf16.msra.mxu1 %v2241_v55  ;;  %v2175_v14 = vld [vmem:[%s3034_s1 + $0x344] ss:$8 sps:$4 sm:$0xff]   ;;  %v220_v55 = vsub.s32 0, %v2337_v15 }
  0x51   :  { %2014 = vmatprep.subr.bf16.mxu1 %v2251_v49 }
  0x53   :  { %959 = vmatpush1.bf16.msra.mxu0 %v2107_v19  ;;  %v2179_v19 = vld [vmem:[%s3034_s1 + $0x350] ss:$8 sps:$4 sm:$0xff]  }
  0x54   :  { %960 = vmatprep.subr.bf16.mxu0 %v2112_v20  ;;  %2015 = vmatpush3.bf16.msra.mxu1 %v2242_v58  ;;  %v2187_v20 = vld [vmem:[%s3034_s1 + $0x364] ss:$8 sps:$4 sm:$0xff]  }
  0x55   :  { %2016 = vmatprep.subr.bf16.mxu1 %v2251_v49 }
  0x57   :  { %961 = vmatpush1.bf16.msra.mxu0 %v2110_v25  ;;  %v2191_v25 = vld [vmem:[%s3034_s1 + $0x370] ss:$8 sps:$4 sm:$0xff]  }
  0x58   :  { %962 = vmatprep.subr.bf16.mxu0 %v2115_v26  ;;  %2017 = vmatpush3.bf16.msra.mxu1 %v2243_v63  ;;  %v2199_v26 = vld [vmem:[%s3034_s1 + $0x384] ss:$8 sps:$4 sm:$0xff]  }
  0x59   :  { %2018 = vmatprep.subr.bf16.mxu1 %v2251_v49 }
  0x5b   :  { %963 = vmatpush1.bf16.msra.mxu0 %v2113_v29  ;;  %v2203_v29 = vld [vmem:[%s3034_s1 + $0x390] ss:$8 sps:$4 sm:$0xff]  }
  0x5c   :  { %964 = vmatprep.subr.bf16.mxu0 %v2118_v30  ;;  %2019 = vmatpush3.bf16.msra.mxu1 %v2244_v2  ;;  %v2211_v30 = vld [vmem:[%s3034_s1 + $0x3a4] ss:$8 sps:$4 sm:$0xff]  }
  0x5d   :  { %2020 = vmatprep.subr.bf16.mxu1 %v2251_v49 }
  0x5f   :  { %965 = vmatpush1.bf16.msra.mxu0 %v2116_v31  ;;  %v2209_v31 = vld [vmem:[%s3034_s1 + $0x3a0] ss:$8 sps:$4 sm:$0xff]  }
  0x60   :  { %966 = vmatprep.subr.bf16.mxu0 %v2121_v34  ;;  %v2223_v34 = vld [vmem:[%s3034_s1 + $0x3c4] ss:$8 sps:$4 sm:$0xff]   ;;  %2021 = vmatpush3.bf16.msra.mxu1 %v2245_v43 }
  0x61   :  { %2022 = vmatprep.subr.bf16.mxu1 %v2251_v49  ;;  %v1208_v43 = vld [vmem:[%s3039_s5 + $0x1e0] sm:$0xff] }
  0x63   :  { %967 = vmatpush1.bf16.msra.mxu0 %v2119_v37  ;;  %v2227_v37 = vld [vmem:[%s3034_s1 + $0x3d0] ss:$8 sps:$4 sm:$0xff]  }
  0x64   :  { %968 = vmatprep.subr.bf16.mxu0 %v2124_v38  ;;  %v2235_v38 = vld [vmem:[%s3034_s1 + $0x3e4] ss:$8 sps:$4 sm:$0xff]  }
  0x67   :  { %969 = vmatpush1.bf16.msra.mxu0 %v2122_v41  ;;  %v2236_v41 = vld [vmem:[%s3034_s1 + $0x3f0] ss:$8 sps:$4 sm:$0xff]  }
  0x68   :  { %970 = vmatprep.subr.bf16.mxu0 %v2127_v42  ;;  %v86_v42 = vpack.c.bf16 %v2650_v1, %v2650_v1 }
  0x6b   :  { %971 = vmatpush1.bf16.msra.mxu0 %v2125_v44  ;;  %v2246_v44 = vld [vmem:[%s3036_s3 + $0x30] sm:$0xff]  }
  0x6c   :  { %972 = vmatprep.subr.bf16.mxu0 %v2130_v45  ;;  %2023 = vmatpush3.bf16.msra.mxu1 %v2246_v44  ;;  %v2247_v45 = vld [vmem:[%s3036_s3 + $0x38] sm:$0xff]  }
  0x6d   :  { %2024 = vmatprep.subr.bf16.mxu1 %v2251_v49 }
  0x6f   :  { %973 = vmatpush1.bf16.msra.mxu0 %v2128_v51 }
  0x70   :  { %974 = vmatprep.subr.bf16.mxu0 %v2133_v53  ;;  %2025 = vmatpush3.bf16.msra.mxu1 %v2247_v45 }
  0x73   :  { %975 = vmatpush1.bf16.msra.mxu0 %v2131_v56  ;;  %v216_v56 = vld [vmem:[%s3037_s2] sm:$0x3] }
  0x74   :  { %976 = vmatprep.subr.bf16.mxu0 %v2136_v57  ;;  %v224_v57 = vsub.s32 1, %v2337_v15  ;;  %v221_v58 = vrot.slane %v216_v56, %v220_v55 }
  0x77   :  { %977 = vmatpush1.bf16.msra.mxu0 %v2134_v60  ;;  %v225_v60 = vrot.slane %v216_v56, %v224_v57  ;;  %v2253_v56 = vmov 0  }
  0x78   :  { %978 = vmatprep.subr.bf16.mxu0 %v2139_v62 }
  0x7b   :  { %979 = vmatpush1.bf16.msra.mxu0 %v2137_v0 }
  0x7c   :  { %980 = vmatprep.subr.bf16.mxu0 %v2145_v47 }
  0x7f   :  { %981 = vmatpush1.bf16.msra.mxu0 %v2143_v3 }
  0x80   :  { %991 = vmatprep.subr.bf16.mxu0 %v2151_v4 }
  0x82   :  { %983 = vmatmul.mubr.bf16.vlgmr.msra.gmra.mrb[0].mxu0 %v84_v5  ;;  %v2000_v5 = vld [vmem:[%s3038_s7] ss:$0 sm:$0xff] }
  0x83   :  { %992 = vmatpush1.bf16.msra.mxu0 %v2149_v6  ;;  %1023 = vmatprep.mubr.bf16.mxu0 %v87_v7 }
  0x84   :  { %993 = vmatprep.subr.bf16.mxu0 %v2157_v8 }
  0x87   :  { %994 = vmatpush1.bf16.msra.mxu0 %v2155_v9 }
  0x88   :  { %995 = vmatprep.subr.bf16.mxu0 %v2163_v10  ;;  %v1148_v10 = vld [vmem:[%s3039_s5] sm:$0xff] }
  0x8b   :  { %996 = vmatpush1.bf16.msra.mxu0 %v2161_v11  ;;  %v1152_v11 = vld [vmem:[%s3039_s5 + $0x20] sm:$0xff] }
  0x8c   :  { %997 = vmatprep.subr.bf16.mxu0 %v2169_v12  ;;  %v1156_v12 = vld [vmem:[%s3039_s5 + $0x40] sm:$0xff] }
  0x8f   :  { %998 = vmatpush1.bf16.msra.mxu0 %v2167_v13  ;;  %v1936_v13 = vcombine.low %v1148_v10, %v1152_v11 }
  0x90   :  { %999 = vmatprep.subr.bf16.mxu0 %v2175_v14  ;;  %v1937_v14 = vcombine.high %v1148_v10, %v1152_v11  ;;  %v1177_v10 = vld [vmem:[%s3039_s5 + $0xe8] sm:$0xff] }
  0x92   :  { %1574 = vmatprep.subr.bf16.mxu1 %v1937_v14  ;;  %v1185_v14 = vld [vmem:[%s3039_s5 + $0x128] sm:$0xff] }
  0x93   :  { %1000 = vmatpush1.bf16.msra.mxu0 %v2173_v16  ;;  %v1160_v16 = vld [vmem:[%s3039_s5 + $0x60] sm:$0xff] }
  0x94   :  { %1001 = vmatprep.subr.bf16.mxu0 %v2181_v17  ;;  %v1945_v17 = vcombine.high %v1156_v12, %v1160_v16 }
  0x97   :  { %1002 = vmatpush1.bf16.msra.mxu0 %v2179_v19  ;;  %v1164_v19 = vld [vmem:[%s3039_s5 + $0x80] sm:$0xff] }
  0x98   :  { %1003 = vmatprep.subr.bf16.mxu0 %v2187_v20  ;;  %v1168_v20 = vld [vmem:[%s3039_s5 + $0xa0] sm:$0xff] }
  0x9b   :  { %1004 = vmatpush1.bf16.msra.mxu0 %v2185_v21  ;;  %v1944_v21 = vcombine.low %v1156_v12, %v1160_v16 }
  0x9c   :  { %1005 = vmatprep.subr.bf16.mxu0 %v2193_v22  ;;  %v1953_v22 = vcombine.high %v1164_v19, %v1168_v20 }
  0x9f   :  { %1006 = vmatpush1.bf16.msra.mxu0 %v2191_v25  ;;  %v1172_v25 = vld [vmem:[%s3039_s5 + $0xc0] sm:$0xff] }
  0xa0   :  { %1007 = vmatprep.subr.bf16.mxu0 %v2199_v26  ;;  %v1176_v26 = vld [vmem:[%s3039_s5 + $0xe0] sm:$0xff] }
  0xa3   :  { %1008 = vmatpush1.bf16.msra.mxu0 %v2197_v27  ;;  %v1952_v27 = vcombine.low %v1164_v19, %v1168_v20  ;;  %v1189_v19 = vld [vmem:[%s3039_s5 + $0x148] sm:$0xff] }
  0xa4   :  { %1009 = vmatprep.subr.bf16.mxu0 %v2205_v28  ;;  %v1961_v28 = vcombine.high %v1172_v25, %v1176_v26  ;;  %v1193_v20 = vld [vmem:[%s3039_s5 + $0x168] sm:$0xff] }
  0xa7   :  { %1010 = vmatpush1.bf16.msra.mxu0 %v2203_v29  ;;  %v1180_v29 = vld [vmem:[%s3039_s5 + $0x100] sm:$0xff] }
  0xa8   :  { %1011 = vmatprep.subr.bf16.mxu0 %v2211_v30  ;;  %v1184_v30 = vld [vmem:[%s3039_s5 + $0x120] sm:$0xff] }
  0xab   :  { %1012 = vmatpush1.bf16.msra.mxu0 %v2209_v31  ;;  %v1960_v31 = vcombine.low %v1172_v25, %v1176_v26  ;;  %v1197_v25 = vld [vmem:[%s3039_s5 + $0x188] sm:$0xff] }
  0xac   :  { %1013 = vmatprep.subr.bf16.mxu0 %v2217_v32  ;;  %v1969_v32 = vcombine.high %v1180_v29, %v1184_v30  ;;  %v1201_v26 = vld [vmem:[%s3039_s5 + $0x1a8] sm:$0xff] }
  0xaf   :  { %1014 = vmatpush1.bf16.msra.mxu0 %v2215_v33  ;;  %v1188_v33 = vld [vmem:[%s3039_s5 + $0x140] sm:$0xff] }
  0xb0   :  { %1015 = vmatprep.subr.bf16.mxu0 %v2223_v34  ;;  %v1192_v34 = vld [vmem:[%s3039_s5 + $0x160] sm:$0xff] }
  0xb3   :  { %1016 = vmatpush1.bf16.msra.mxu0 %v2221_v35  ;;  %v1968_v35 = vcombine.low %v1180_v29, %v1184_v30  ;;  %v1205_v29 = vld [vmem:[%s3039_s5 + $0x1c8] sm:$0xff] }
  0xb4   :  { %1017 = vmatprep.subr.bf16.mxu0 %v2229_v36  ;;  %v1977_v36 = vcombine.high %v1188_v33, %v1192_v34  ;;  %v1209_v30 = vld [vmem:[%s3039_s5 + $0x1e8] sm:$0xff] }
  0xb7   :  { %1018 = vmatpush1.bf16.msra.mxu0 %v2227_v37  ;;  %v1196_v37 = vld [vmem:[%s3039_s5 + $0x180] sm:$0xff] }
  0xb8   :  { %1019 = vmatprep.subr.bf16.mxu0 %v2235_v38  ;;  %v1200_v38 = vld [vmem:[%s3039_s5 + $0x1a0] sm:$0xff] }
  0xbb   :  { %1020 = vmatpush1.bf16.msra.mxu0 %v2233_v39  ;;  %v1976_v39 = vcombine.low %v1188_v33, %v1192_v34  ;;  %v1150_v33 = vld [vmem:[%s3039_s5 + $0x10] sm:$0xff] }
  0xbc   :  { %1021 = vmatprep.subr.bf16.mxu0 %v2238_v40  ;;  %v1985_v40 = vcombine.high %v1196_v37, %v1200_v38  ;;  %v1154_v34 = vld [vmem:[%s3039_s5 + $0x30] sm:$0xff] }
  0xbf   :  { %1022 = vmatpush1.bf16.msra.mxu0 %v2236_v41  ;;  %v1984_v41 = vcombine.low %v1196_v37, %v1200_v38  ;;  %v1158_v37 = vld [vmem:[%s3039_s5 + $0x50] sm:$0xff] }
  0xc0   :  { %v1162_v38 = vld [vmem:[%s3039_s5 + $0x70] sm:$0xff] }
  0xc2   :  { %1024 = vmatmul.mubr.bf16.vlgmr.msra.gmra.mrb[0].mxu0 %v86_v42  ;;  %v1204_v42 = vld [vmem:[%s3039_s5 + $0x1c0] sm:$0xff] }
  0xc3   :  { %v1993_v44 = vcombine.high %v1204_v42, %v1208_v43  ;;  %v1992_v45 = vcombine.low %v1204_v42, %v1208_v43  ;;  %v1170_v42 = vld [vmem:[%s3039_s5 + $0xb0] sm:$0xff]  ;;  %v1948_v43 = vcombine.low %v1158_v37, %v1162_v38 }
 0x11e   :  { %v902_v46 = vpop.f32.mrb[0].mxu1 }
 0x11f   :  { %v904_v48 = vpop.f32.mrb[1].mxu1  ;;  %v903_v61 = vadd.f32 %v902_v46, %v221_v58  ;;  %v1149_v46 = vld [vmem:[%s3039_s5 + $0x8] sm:$0xff]  ;;  %v1927_v58 = vld [vmem:[%s3040_s4] ss:$0 sm:$0xff] }
 0x120   :  { %v906_v51 = vpop.f32.mrb[2].mxu1  ;;  %v905_v49 = vadd.f32 %v904_v48, %v225_v60  ;;  %v1153_v48 = vld [vmem:[%s3039_s5 + $0x28] sm:$0xff] }
 0x121   :  { %v907_v53 = vpop.f32.mrb[3].mxu1  ;;  %v1939_v51 = vcombine.high %v1149_v46, %v1153_v48 }
 0x122   :  { %v1938_v53 = vcombine.low %v1149_v46, %v1153_v48  ;;  %v1178_v46 = vld [vmem:[%s3039_s5 + $0xf0] sm:$0xff] }
 0x195   :  { %v1025_v62 = vpop.f32.mrb[0].mxu0 }
 0x196   :  { %v2031_v63 = vadd.f32 %v1025_v62, %v903_v61  ;;  %v1027_v0 = vpop.f32.mrb[1].mxu0 }
 0x197   :  { %v2033_v47 = vadd.f32 %v1027_v0, %v905_v49  ;;  %v1029_v2 = vpop.f32.mrb[2].mxu0  ;;  %v1161_v0 = vld [vmem:[%s3039_s5 + $0x68] sm:$0xff] }
 0x198   :  { %v1032_v3 = vmax.f32 %v2031_v63, 0.0  ;;  %v1030_v4 = vpop.f32.mrb[3].mxu0  ;;  %v1157_v63 = vld [vmem:[%s3039_s5 + $0x48] sm:$0xff] }
 0x199   :  { %v1033_v6 = vmax.f32 %v2033_v47, 0.0  ;;  %v1947_v4 = vcombine.high %v1157_v63, %v1161_v0 }
 0x19a   :  { %v1034_v7 = vpack.c.bf16 %v1032_v3, %v1032_v3 }
 0x19b   :  { %v1745_v8 = vmul.f32 %v2000_v5, %v1033_v6  ;;  %v1165_v5 = vld [vmem:[%s3039_s5 + $0x88] sm:$0xff] }
 0x19c   :  { %2027 = vmatmul.mubr.bf16.vlgmr.msra.gmra.mrb[4].mxu1 %v1034_v7  ;;  %v1169_v6 = vld [vmem:[%s3039_s5 + $0xa8] sm:$0xff]  ;;  %v1946_v7 = vcombine.low %v1157_v63, %v1161_v0 }
 0x19d   :  { %v1747_v9 = vsel %vm1746_vm1, %v1745_v8, 0.0  ;;  %1575 = vmatpush1.bf16.msra.mxu1 %v1936_v13  ;;  %1606 = vmatprep.mubr.bf16.mxu1 %v2253_v56  ;;  %v1955_v8 = vcombine.high %v1165_v5, %v1169_v6  ;;  %v1954_v11 = vcombine.low %v1165_v5, %v1169_v6  ;;  %v1181_v13 = vld [vmem:[%s3039_s5 + $0x108] sm:$0xff]  ;;  %v1206_v6 = vld [vmem:[%s3039_s5 + $0x1d0] sm:$0xff] }
 0x19e   :  { %1748 = vadd.xlane.f32.xlu0 %v1747_v9  ;;  %1576 = vmatprep.subr.bf16.mxu1 %v1945_v17  ;;  %v1173_v9 = vld [vmem:[%s3039_s5 + $0xc8] sm:$0xff]  ;;  %v1971_v17 = vcombine.high %v1181_v13, %v1185_v14 }
 0x19f   :  { %v1963_v12 = vcombine.high %v1173_v9, %v1177_v10  ;;  %v1962_v16 = vcombine.low %v1173_v9, %v1177_v10  ;;  %v1151_v10 = vld [vmem:[%s3039_s5 + $0x18] sm:$0xff] }
 0x1a1   :  { %1577 = vmatpush1.bf16.msra.mxu1 %v1944_v21  ;;  %v1970_v21 = vcombine.low %v1181_v13, %v1185_v14  ;;  %v1159_v14 = vld [vmem:[%s3039_s5 + $0x58] sm:$0xff] }
 0x1a2   :  { %1578 = vmatprep.subr.bf16.mxu1 %v1953_v22  ;;  %v1979_v22 = vcombine.high %v1189_v19, %v1193_v20 }
 0x1a5   :  { %1579 = vmatpush1.bf16.msra.mxu1 %v1952_v27  ;;  %v1978_v27 = vcombine.low %v1189_v19, %v1193_v20  ;;  %v1167_v20 = vld [vmem:[%s3039_s5 + $0x98] sm:$0xff] }
 0x1a6   :  { %1580 = vmatprep.subr.bf16.mxu1 %v1961_v28  ;;  %v1987_v28 = vcombine.high %v1197_v25, %v1201_v26 }
 0x1a9   :  { %1581 = vmatpush1.bf16.msra.mxu1 %v1960_v31  ;;  %v1986_v31 = vcombine.low %v1197_v25, %v1201_v26  ;;  %v1175_v26 = vld [vmem:[%s3039_s5 + $0xd8] sm:$0xff] }
 0x1aa   :  { %1582 = vmatprep.subr.bf16.mxu1 %v1969_v32  ;;  %v1995_v32 = vcombine.high %v1205_v29, %v1209_v30 }
 0x1ad   :  { %1583 = vmatpush1.bf16.msra.mxu1 %v1968_v35  ;;  %v1994_v35 = vcombine.low %v1205_v29, %v1209_v30  ;;  %v1183_v30 = vld [vmem:[%s3039_s5 + $0x118] sm:$0xff] }
 0x1ae   :  { %1584 = vmatprep.subr.bf16.mxu1 %v1977_v36  ;;  %v1941_v36 = vcombine.high %v1150_v33, %v1154_v34 }
 0x1b1   :  { %1585 = vmatpush1.bf16.msra.mxu1 %v1976_v39  ;;  %v1940_v39 = vcombine.low %v1150_v33, %v1154_v34  ;;  %v1191_v33 = vld [vmem:[%s3039_s5 + $0x158] sm:$0xff] }
 0x1b2   :  { %1586 = vmatprep.subr.bf16.mxu1 %v1985_v40  ;;  %v1949_v40 = vcombine.high %v1158_v37, %v1162_v38  ;;  %v1195_v34 = vld [vmem:[%s3039_s5 + $0x178] sm:$0xff] }
 0x1b3   :  { %v1199_v37 = vld [vmem:[%s3039_s5 + $0x198] sm:$0xff] }
 0x1b4   :  { %v1203_v38 = vld [vmem:[%s3039_s5 + $0x1b8] sm:$0xff] }
 0x1b5   :  { %1587 = vmatpush1.bf16.msra.mxu1 %v1984_v41  ;;  %v1166_v41 = vld [vmem:[%s3039_s5 + $0x90] sm:$0xff] }
 0x1b6   :  { %1588 = vmatprep.subr.bf16.mxu1 %v1993_v44  ;;  %v1957_v44 = vcombine.high %v1166_v41, %v1170_v42  ;;  %v1956_v48 = vcombine.low %v1166_v41, %v1170_v42  ;;  %v1207_v41 = vld [vmem:[%s3039_s5 + $0x1d8] sm:$0xff] }
 0x1b7   :  { %v1211_v42 = vld [vmem:[%s3039_s5 + $0x1f8] sm:$0xff] }
 0x1b9   :  { %1589 = vmatpush1.bf16.msra.mxu1 %v1992_v45  ;;  %v1174_v45 = vld [vmem:[%s3039_s5 + $0xd0] sm:$0xff] }
 0x1ba   :  { %1615 = vmatprep.subr.bf16.mxu1 %v1939_v51  ;;  %v1965_v51 = vcombine.high %v1174_v45, %v1178_v46 }
 0x26f   :  { %v1140_v60 = vpop.f32.mrb[4].mxu1 }
 0x270   :  { %v1141_v61 = vadd.f32 %v1927_v58, %v1140_v60  ;;  %v2028_v49 = vpop.f32.mrb[5].mxu1  ;;  %v1186_v58 = vld [vmem:[%s3039_s5 + $0x130] sm:$0xff]  ;;  %v1964_v60 = vcombine.low %v1174_v45, %v1178_v46  ;;  %v1998_v45 = vcombine.low %v1207_v41, %v1211_v42  ;;  %v1212_v46 = vld [vmem:[%s3041_s6] sm:$0xff] }
 0x271   :  { %v1143_v62 = vpop.f32.mrb[6].mxu1  ;;  %v1190_v49 = vld [vmem:[%s3039_s5 + $0x150] sm:$0xff] }
 0x272   :  { %v1146_v47 = vmax.f32 %v1141_v61, 0.0  ;;  %v2029_v2 = vpop.f32.mrb[7].mxu1  ;;  %v1194_v62 = vld [vmem:[%s3039_s5 + $0x170] sm:$0xff] }
 0x273   :  { %v1981_v0 = vcombine.high %v1190_v49, %v1194_v62  ;;  %v1202_v2 = vld [vmem:[%s3039_s5 + $0x1b0] sm:$0xff] }
 0x274   :  { %v2858_v3 = vpack.c.bf16 %v1146_v47, %v1146_v47  ;;  %v1198_v47 = vld [vmem:[%s3039_s5 + $0x190] sm:$0xff] }
 0x275   :  { %v1989_v5 = vcombine.high %v1198_v47, %v1202_v2 }
 0x276   :  { %1607 = vmatmul.mubr.bf16.vlgmr.msra.gmra.mrb[8].mxu1 %v2858_v3 }
 0x277   :  { %1616 = vmatpush1.bf16.msra.mxu1 %v1938_v53  ;;  %1647 = vmatprep.mubr.bf16.mxu1 %v2253_v56  ;;  %v1182_v53 = vld [vmem:[%s3039_s5 + $0x110] sm:$0xff] }
 0x278   :  { %1617 = vmatprep.subr.bf16.mxu1 %v1947_v4  ;;  %v1973_v61 = vcombine.high %v1182_v53, %v1186_v58  ;;  %v1972_v63 = vcombine.low %v1182_v53, %v1186_v58  ;;  %v1980_v4 = vcombine.low %v1190_v49, %v1194_v62 }
 0x27b   :  { %1618 = vmatpush1.bf16.msra.mxu1 %v1946_v7  ;;  %v1210_v7 = vld [vmem:[%s3039_s5 + $0x1f0] sm:$0xff] }
 0x27c   :  { %1619 = vmatprep.subr.bf16.mxu1 %v1955_v8  ;;  %v1988_v8 = vcombine.low %v1198_v47, %v1202_v2  ;;  %v1997_v9 = vcombine.high %v1206_v6, %v1210_v7 }
 0x27f   :  { %1620 = vmatpush1.bf16.msra.mxu1 %v1954_v11  ;;  %v1155_v11 = vld [vmem:[%s3039_s5 + $0x38] sm:$0xff] }
 0x280   :  { %1621 = vmatprep.subr.bf16.mxu1 %v1963_v12  ;;  %v1996_v12 = vcombine.low %v1206_v6, %v1210_v7  ;;  %v1943_v13 = vcombine.high %v1151_v10, %v1155_v11 }
 0x283   :  { %1622 = vmatpush1.bf16.msra.mxu1 %v1962_v16  ;;  %v1163_v16 = vld [vmem:[%s3039_s5 + $0x78] sm:$0xff] }
 0x284   :  { %1623 = vmatprep.subr.bf16.mxu1 %v1971_v17  ;;  %v1942_v17 = vcombine.low %v1151_v10, %v1155_v11  ;;  %v1951_v19 = vcombine.high %v1159_v14, %v1163_v16 }
 0x287   :  { %1624 = vmatpush1.bf16.msra.mxu1 %v1970_v21  ;;  %v1171_v21 = vld [vmem:[%s3039_s5 + $0xb8] sm:$0xff] }
 0x288   :  { %1625 = vmatprep.subr.bf16.mxu1 %v1979_v22  ;;  %v1950_v22 = vcombine.low %v1159_v14, %v1163_v16  ;;  %v1959_v25 = vcombine.high %v1167_v20, %v1171_v21 }
 0x28b   :  { %1626 = vmatpush1.bf16.msra.mxu1 %v1978_v27  ;;  %v1179_v27 = vld [vmem:[%s3039_s5 + $0xf8] sm:$0xff] }
 0x28c   :  { %1627 = vmatprep.subr.bf16.mxu1 %v1987_v28  ;;  %v1958_v28 = vcombine.low %v1167_v20, %v1171_v21  ;;  %v1967_v29 = vcombine.high %v1175_v26, %v1179_v27 }
 0x28f   :  { %1628 = vmatpush1.bf16.msra.mxu1 %v1986_v31  ;;  %v1966_v31 = vcombine.low %v1175_v26, %v1179_v27 }
 0x290   :  { %1629 = vmatprep.subr.bf16.mxu1 %v1995_v32 }
 0x293   :  { %1630 = vmatpush1.bf16.msra.mxu1 %v1994_v35 }
 0x294   :  { %1656 = vmatprep.subr.bf16.mxu1 %v1941_v36  ;;  %v1983_v36 = vcombine.high %v1191_v33, %v1195_v34 }
 0x296   :  { %1648 = vmatmul.mubr.bf16.vlgmr.msra.gmra.mrb[12].mxu1 %v2858_v3 }
 0x297   :  { %1657 = vmatpush1.bf16.msra.mxu1 %v1940_v39  ;;  %1688 = vmatprep.mubr.bf16.mxu1 %v2253_v56  ;;  %v1982_v39 = vcombine.low %v1191_v33, %v1195_v34 }
 0x298   :  { %1658 = vmatprep.subr.bf16.mxu1 %v1949_v40  ;;  %v1991_v40 = vcombine.high %v1199_v37, %v1203_v38 }
 0x29b   :  { %1659 = vmatpush1.bf16.msra.mxu1 %v1948_v43  ;;  %v1990_v43 = vcombine.low %v1199_v37, %v1203_v38 }
 0x29c   :  { %1660 = vmatprep.subr.bf16.mxu1 %v1957_v44  ;;  %v1999_v44 = vcombine.high %v1207_v41, %v1211_v42 }
 0x29f   :  { %1661 = vmatpush1.bf16.msra.mxu1 %v1956_v48  ;;  %v1217_v48 = vrot.slane %v1212_v46, %v220_v55 }
 0x2a0   :  { %1662 = vmatprep.subr.bf16.mxu1 %v1965_v51  ;;  %v1221_v51 = vrot.slane %v1212_v46, %v224_v57  ;;  %v1228_v57 = vsub.s32 3, %v2337_v15 }
 0x2a2   :  { %v1229_v7 = vrot.slane %v1212_v46, %v1228_v57 }
 0x2a3   :  { %1663 = vmatpush1.bf16.msra.mxu1 %v1964_v60 }
 0x2a4   :  { %1664 = vmatprep.subr.bf16.mxu1 %v1973_v61 }
 0x2a7   :  { %1665 = vmatpush1.bf16.msra.mxu1 %v1972_v63 }
 0x2a8   :  { %1666 = vmatprep.subr.bf16.mxu1 %v1981_v0 }
 0x2ab   :  { %1667 = vmatpush1.bf16.msra.mxu1 %v1980_v4 }
 0x2ac   :  { %1668 = vmatprep.subr.bf16.mxu1 %v1989_v5  ;;  %v1224_v5 = vsub.s32 2, %v2337_v15 }
 0x2ae   :  { %v1225_v6 = vrot.slane %v1212_v46, %v1224_v5 }
 0x2af   :  { %1669 = vmatpush1.bf16.msra.mxu1 %v1988_v8 }
 0x2b0   :  { %1670 = vmatprep.subr.bf16.mxu1 %v1997_v9 }
 0x2b3   :  { %1671 = vmatpush1.bf16.msra.mxu1 %v1996_v12 }
 0x2b4   :  { %1697 = vmatprep.subr.bf16.mxu1 %v1943_v13 }
 0x2b6   :  { %1689 = vmatmul.mubr.bf16.vlgmr.msra.gmra.mrb[16].mxu1 %v2858_v3 }
 0x2b7   :  { %1698 = vmatpush1.bf16.msra.mxu1 %v1942_v17  ;;  %1729 = vmatprep.mubr.bf16.mxu1 %v2253_v56  ;;  %v1187_v56 = vld [vmem:[%s3039_s5 + $0x138] sm:$0xff] }
 0x2b8   :  { %1699 = vmatprep.subr.bf16.mxu1 %v1951_v19  ;;  %v1975_v32 = vcombine.high %v1183_v30, %v1187_v56  ;;  %v1974_v35 = vcombine.low %v1183_v30, %v1187_v56 }
 0x2bb   :  { %1700 = vmatpush1.bf16.msra.mxu1 %v1950_v22  ;;  %v1232_v22 = vsub.s32 4, %v2337_v15 }
 0x2bc   :  { %1701 = vmatprep.subr.bf16.mxu1 %v1959_v25  ;;  %v1236_v25 = vsub.s32 5, %v2337_v15 }
 0x2bd   :  { %v1233_v26 = vrot.slane %v1212_v46, %v1232_v22 }
 0x2be   :  { %v1237_v27 = vrot.slane %v1212_v46, %v1236_v25 }
 0x2bf   :  { %1702 = vmatpush1.bf16.msra.mxu1 %v1958_v28 }
 0x2c0   :  { %1703 = vmatprep.subr.bf16.mxu1 %v1967_v29 }
 0x2c3   :  { %1704 = vmatpush1.bf16.msra.mxu1 %v1966_v31 }
 0x2c4   :  { %1705 = vmatprep.subr.bf16.mxu1 %v1975_v32 }
 0x2c7   :  { %1706 = vmatpush1.bf16.msra.mxu1 %v1974_v35 }
 0x2c8   :  { %1707 = vmatprep.subr.bf16.mxu1 %v1983_v36 }
 0x2cb   :  { %1708 = vmatpush1.bf16.msra.mxu1 %v1982_v39  ;;  %v1240_v39 = vsub.s32 6, %v2337_v15 }
 0x2cc   :  { %1709 = vmatprep.subr.bf16.mxu1 %v1991_v40  ;;  %v1244_v40 = vsub.s32 7, %v2337_v15 }
 0x2cd   :  { %v1241_v41 = vrot.slane %v1212_v46, %v1240_v39 }
 0x2ce   :  { %v1245_v42 = vrot.slane %v1212_v46, %v1244_v40  ;;  %v1751_v46 = vstv %s3042_s8 }
 0x2cf   :  { %1710 = vmatpush1.bf16.msra.mxu1 %v1990_v43 }
 0x2d0   :  { %1711 = vmatprep.subr.bf16.mxu1 %v1999_v44 }
 0x2d3   :  { %1712 = vmatpush1.bf16.msra.mxu1 %v1998_v45 }
 0x2d6   :  { %1730 = vmatmul.mubr.bf16.vlgmr.msra.gmra.mrb[20].mxu1 %v2858_v3 }
 0x349   :  { %v1608_v53 = vpop.f32.mrb[8].mxu1 }
 0x34a   :  { %v1609_v58 = vadd.f32 %v1608_v53, %v1217_v48  ;;  %v1610_v60 = vpop.f32.mrb[9].mxu1 }
 0x34b   :  { %v1611_v61 = vadd.f32 %v1610_v60, %v1221_v51  ;;  %v1612_v49 = vpop.f32.mrb[10].mxu1 }
 0x34c   :  { %v1753_v62 = vsub.f32 %v1609_v58, %v2441_v50  ;;  %v1613_v63 = vpop.f32.mrb[11].mxu1 }
 0x34d   :  { %v1754_v3 = vsub.f32 %v1611_v61, %v2455_v54  ;;  %v1749_v63 = vpop.xlane.xlu0 %1748 }
 0x34e   :  { %v1761_v0 = vmul.f32 %v1753_v62, %v1753_v62 }
 0x34f   :  { %v1762_v47 = vmul.f32 %v1754_v3, %v1754_v3  ;;  %v1752_v3 = vadd.f32 %v1751_v46, %v1749_v63 }
 0x350   :  { %v1769_v2 = vsel %vm1746_vm1, %v1761_v0, 0.0 }
 0x351   :  { %v1770_v4 = vsel %vm1746_vm1, %v1762_v47, 0.0  ;;  %v1788_v0 = vsub.f32 0.0, %v1752_v3 }
 0x352   :  { %v1771_v55 = vadd.f32 %v1770_v4, %v1769_v2 }
 0x369   :  { %v1649_v8 = vpop.f32.mrb[12].mxu1 }
 0x36a   :  { %v1650_v9 = vadd.f32 %v1649_v8, %v1225_v6  ;;  %v1651_v10 = vpop.f32.mrb[13].mxu1 }
 0x36b   :  { %v1652_v50 = vadd.f32 %v1651_v10, %v1229_v7  ;;  %v1653_v11 = vpop.f32.mrb[14].mxu1 }
 0x36c   :  { %v1755_v54 = vsub.f32 %v1650_v9, %v2358_v23  ;;  %v1654_v12 = vpop.f32.mrb[15].mxu1 }
 0x36d   :  { %v1756_v13 = vsub.f32 %v1652_v50, %v2362_v24 }
 0x36e   :  { %v1763_v14 = vmul.f32 %v1755_v54, %v1755_v54 }
 0x36f   :  { %v1764_v16 = vmul.f32 %v1756_v13, %v1756_v13 }
 0x370   :  { %v1772_v17 = vsel %vm1746_vm1, %v1763_v14, 0.0 }
 0x371   :  { %v1773_v19 = vadd.f32 %v1772_v17, %v1771_v55  ;;  %v1774_v20 = vsel %vm1746_vm1, %v1764_v16, 0.0 }
 0x373   :  { %v1775_v21 = vadd.f32 %v1774_v20, %v1773_v19 }
 0x389   :  { %v1690_v28 = vpop.f32.mrb[16].mxu1 }
 0x38a   :  { %v1691_v29 = vadd.f32 %v1690_v28, %v1233_v26  ;;  %v1692_v23 = vpop.f32.mrb[17].mxu1 }
 0x38b   :  { %v1693_v30 = vadd.f32 %v1692_v23, %v1237_v27  ;;  %v1694_v56 = vpop.f32.mrb[18].mxu1 }
 0x38c   :  { %v1757_v24 = vsub.f32 %v1691_v29, %v2448_v52  ;;  %v1695_v31 = vpop.f32.mrb[19].mxu1 }
 0x38d   :  { %v1758_v32 = vsub.f32 %v1693_v30, %v2470_v59 }
 0x38e   :  { %v1765_v33 = vmul.f32 %v1757_v24, %v1757_v24 }
 0x38f   :  { %v1766_v34 = vmul.f32 %v1758_v32, %v1758_v32 }
 0x390   :  { %v1776_v35 = vsel %vm1746_vm1, %v1765_v33, 0.0 }
 0x391   :  { %v1777_v36 = vadd.f32 %v1776_v35, %v1775_v21  ;;  %v1778_v37 = vsel %vm1746_vm1, %v1766_v34, 0.0 }
 0x393   :  { %v1779_v38 = vadd.f32 %v1778_v37, %v1777_v36 }
 0x3a9   :  { %v1731_v43 = vpop.f32.mrb[20].mxu1 }
 0x3aa   :  { %v1732_v44 = vadd.f32 %v1731_v43, %v1241_v41  ;;  %v1733_v52 = vpop.f32.mrb[21].mxu1 }
 0x3ab   :  { %v1734_v45 = vadd.f32 %v1733_v52, %v1245_v42  ;;  %v1735_v48 = vpop.f32.mrb[22].mxu1 }
 0x3ac   :  { %v1759_v59 = vsub.f32 %v1732_v44, %v2650_v1  ;;  %v1736_v51 = vpop.f32.mrb[23].mxu1  ;;  %v1789_v1 = vmul.f32 1.442695, %v1788_v0 }
 0x3ad   :  { %v1760_v53 = vsub.f32 %v1734_v45, %v2664_v18 }
 0x3ae   :  { %v1767_v58 = vmul.f32 %v1759_v59, %v1759_v59  ;;  %2248 = vpow2.f32 %v1789_v1 }
 0x3af   :  { %v1768_v60 = vmul.f32 %v1760_v53, %v1760_v53 }
 0x3b0   :  { %v1780_v61 = vsel %vm1746_vm1, %v1767_v58, 0.0 }
 0x3b1   :  { %v1781_v49 = vadd.f32 %v1780_v61, %v1779_v38  ;;  %v1782_v62 = vsel %vm1746_vm1, %v1768_v60, 0.0 }
 0x3b3   :  { %v1783_v15 = vadd.f32 %v1782_v62, %v1781_v49 }
 0x3b5   :  { %1784 = vadd.xlane.f32.xlu0 %v1783_v15 }
 0x3b8   :  { %v2249_v2 = vpop.eup %2248 }
 0x442   :  { %v1785_v47 = vpop.xlane.xlu0 %1784 }
 0x443   :  { %v1787_v18 = vmul.f32 0.0009765625, %v1785_v47 }
 0x445   :  { %v1791_v4 = vmul.f32 %v2249_v2, %v1787_v18 }
 0x447   :  { %v1792_v55 = vadd.f32 %v1791_v4, %v1752_v3 }
 0x449   :  { %1794 = vst.msk [vmem:[%s3043_s9] sm:$0x3] %vm1793_vm2, %v1792_v55 }

</bundles_post_ra>
